<compile_context>
chip_gen: v6e
topology: v6e:2x2x1
jax: 0.10.0
libtpu: 0.0.40
codegen_flags: <defaults>
</compile_context>

<pallas_src>
import math
import functools

import jax
import jax.numpy as jnp
from jax.experimental import pallas as pl
from jax.experimental.pallas import tpu as pltpu


def positional_encoding(max_seq_len: int, dim: int) -> jnp.ndarray:
    """Matches Andromeda.positional_encoding (before the unsqueeze/transpose)."""
    position = jnp.arange(max_seq_len, dtype=jnp.float32)[:, None]          # (L, 1)
    div_term = jnp.exp(
        jnp.arange(0, dim, 2, dtype=jnp.float32) * (-(math.log(10000.0) / dim))
    )                                                                        # (D/2,)
    pe = jnp.zeros((max_seq_len, dim), jnp.float32)
    pe = pe.at[:, 0::2].set(jnp.sin(position * div_term))
    pe = pe.at[:, 1::2].set(jnp.cos(position * div_term))
    return pe                                                                # (L, D)


def _largest_tile(total: int, cap: int, align: int) -> int:
    """Largest divisor of `total` that is <= cap and a multiple of `align`.

    Falls back to `total` itself (a full-extent block is always legal)."""
    best = None
    d = align
    while d <= min(total, cap):
        if total % d == 0:
            best = d
        d += align
    return best if best is not None else total


def _choose_tiles(S: int, D: int, V: int, budget_bytes: int = 40 * 1024 * 1024):
    """Pick (ts, tv) so double-buffered tiles stay well inside scoped VMEM
    (re-derived for the smallest per-TC VMEM, 64 MiB on v7x)."""
    ts = _largest_tile(S, 256, 8)
    tv = _largest_tile(V, 512, 128)

    def usage(ts_, tv_):
        return (2 * ts_ * D * 4        # pos-enc tiles (f32, double-buffered)
                + ts_ * D * 4          # gathered embedding rows (f32 scratch)
                + ts_ * D * 2          # bf16 activation scratch
                + 2 * D * tv_ * 2      # fc_out weight tiles (bf16, double-buffered)
                + 2 * tv_ * 4          # bias tiles
                + 2 * ts_ * tv_ * 4)   # output tiles (f32, double-buffered)

    while (usage(ts, tv) > budget_bytes and tv > 128
           and (tv // 2) % 128 == 0 and V % (tv // 2) == 0):
        tv //= 2
    while (usage(ts, tv) > budget_bytes and ts > 8
           and (ts // 2) % 8 == 0 and S % (ts // 2) == 0):
        ts //= 2
    return ts, tv


def _andromeda_kernel(ts, scale, ids_ref,
                      emb_hbm, pos_ref, w_ref, b_ref,
                      o_ref,
                      emb_buf, xb_ref, sems):
    # ids_ref:  (B, S) int32 token ids in SMEM (scalar prefetch)
    # emb_hbm:  (V, D)  f32 embedding table, left in HBM (pl.ANY)
    # pos_ref:  (ts, D) f32 positional-encoding tile
    # w_ref:    (D, tv) bf16 fc_out weight tile (already transposed to (D, V))
    # b_ref:    (1, tv) f32 fc_out bias tile
    # o_ref:    (1, ts, tv) f32 logits tile
    # emb_buf:  (ts, D) f32 VMEM scratch for the gathered embedding rows
    # xb_ref:   (ts, D) bf16 VMEM scratch: (emb * sqrt(D) + pos), reused per vocab tile
    # sems:     (ts,) DMA semaphores
    b = pl.program_id(0)
    s = pl.program_id(1)
    j = pl.program_id(2)

    @pl.when(j == 0)
    def _prologue():
        # Fused embedding gather: row-wise DMA straight from the HBM table.
        for r in range(ts):
            tok = ids_ref[b, s * ts + r]
            pltpu.make_async_copy(
                emb_hbm.at[pl.ds(tok, 1)], emb_buf.at[pl.ds(r, 1)], sems.at[r]
            ).start()
        for r in range(ts):
            pltpu.make_async_copy(
                emb_hbm.at[pl.ds(0, 1)], emb_buf.at[pl.ds(r, 1)], sems.at[r]
            ).wait()
        # Scale + positional add in f32, downcast once to bf16 for the MXU.
        # Hoisted out of the vocab loop (recomputed only when (b, s) changes).
        xb_ref[...] = (emb_buf[...] * scale + pos_ref[...]).astype(xb_ref.dtype)

    o_ref[0] = (
        jnp.dot(xb_ref[...], w_ref[...], preferred_element_type=jnp.float32)
        + b_ref[...]
    )


def andromeda_forward(input_ids, emb_table, pos_enc, w_out_t, b_out):
    """input_ids: (B, S) int32; returns logits (B, S, V) float32."""
    B, S = input_ids.shape
    V, D = emb_table.shape
    assert w_out_t.shape == (D, V)
    assert S <= pos_enc.shape[0], "sequence length exceeds max_seq_len"

    ts, tv = _choose_tiles(S, D, V)

    ids = input_ids.astype(jnp.int32)
    emb_f32 = emb_table.astype(jnp.float32)
    pos = pos_enc[:S].astype(jnp.float32)                   # (S, D), no broadcast slab
    w_bf16 = w_out_t.astype(jnp.bfloat16)                   # bf16 MXU weight stream
    bias2d = b_out.reshape(1, V).astype(jnp.float32)

    scale = float(math.sqrt(D))
    kernel = functools.partial(_andromeda_kernel, ts, scale)

    logits = pl.pallas_call(
        kernel,
        out_shape=jax.ShapeDtypeStruct((B, S, V), jnp.float32),
        grid_spec=pltpu.PrefetchScalarGridSpec(
            num_scalar_prefetch=1,
            grid=(B, S // ts, V // tv),
            in_specs=[
                pl.BlockSpec(memory_space=pl.ANY),                       # emb table (HBM)
                pl.BlockSpec((ts, D), lambda b, s, j, ids: (s, 0)),      # pos-enc tile
                pl.BlockSpec((D, tv), lambda b, s, j, ids: (0, j)),      # W^T vocab tile
                pl.BlockSpec((1, tv), lambda b, s, j, ids: (0, j)),      # bias vocab tile
            ],
            out_specs=pl.BlockSpec((1, ts, tv), lambda b, s, j, ids: (b, s, j)),
            scratch_shapes=[
                pltpu.VMEM((ts, D), jnp.float32),     # gathered embedding rows
                pltpu.VMEM((ts, D), jnp.bfloat16),    # scaled + pos, bf16 for MXU
                pltpu.SemaphoreType.DMA((ts,)),
            ],
        ),
        compiler_params=pltpu.CompilerParams(
            dimension_semantics=("parallel", "parallel", "arbitrary"),
            vmem_limit_bytes=48 * 1024 * 1024,
        ),
    )(ids, emb_f32, pos, w_bf16, bias2d)

    return logits


if __name__ == "__main__":
    # Small synthetic config (no tokenizer / checkpoints): vocab=1024, dim=128.
    B, S, D, V = 2, 8, 128, 1024
    MAX_SEQ_LEN = 16

    key = jax.random.PRNGKey(0)
    k_ids, k_emb, k_w, k_b = jax.random.split(key, 4)

    input_ids = jax.random.randint(k_ids, (B, S), 0, V, dtype=jnp.int32)
    emb_table = jax.random.normal(k_emb, (V, D), dtype=jnp.float32) * 0.02
    # fc_out: nn.Linear(dim, vocab) -> weight (V, D), bias (V,).  Kernel uses W^T.
    w_out = jax.random.normal(k_w, (V, D), dtype=jnp.float32) * 0.02
    b_out = jax.random.normal(k_b, (V,), dtype=jnp.float32) * 0.02
    pos_enc = positional_encoding(MAX_SEQ_LEN, D)

    logits = andromeda_forward(input_ids, emb_table, pos_enc, w_out.T, b_out)
    logits = jax.block_until_ready(logits)

    # Pure-JAX reference of the fused path (same bf16 rounding of x and W).
    x = jnp.take(emb_table, input_ids, axis=0) * math.sqrt(D) + pos_enc[:S][None]
    xb = x.astype(jnp.bfloat16).astype(jnp.float32)
    wb = w_out.T.astype(jnp.bfloat16).astype(jnp.float32)
    ref = jnp.einsum("bsd,dv->bsv", xb, wb,
                     preferred_element_type=jnp.float32) + b_out

    assert logits.shape == (B, S, V)
    err = float(jnp.max(jnp.abs(logits - ref)))
    assert jnp.allclose(logits, ref, atol=2e-3, rtol=2e-3), f"max abs err {err}"

    print("KERNEL_OK")
</pallas_src>

<mosaic_0001>
module attributes {stable_mosaic.version = 11 : i64} {
  func.func @_andromeda_kernel(%arg0: i32, %arg1: i32, %arg2: i32, %arg3: memref<2x8xi32, #tpu.memory_space<smem>>, %arg4: memref<1024x128xf32, #tpu.memory_space<any>>, %arg5: memref<8x128xf32, #tpu.memory_space<vmem>>, %arg6: memref<128x512xbf16, #tpu.memory_space<vmem>>, %arg7: memref<1x512xf32, #tpu.memory_space<vmem>>, %arg8: memref<1x8x512xf32, #tpu.memory_space<vmem>>, %arg9: memref<8x128xf32, #tpu.memory_space<vmem>>, %arg10: memref<8x128xbf16, #tpu.memory_space<vmem>>, %arg11: memref<8x!tpu.dma_semaphore, #tpu.memory_space<semaphore_mem>>) attributes {dimension_semantics = [#tpu.dimension_semantics<parallel>, #tpu.dimension_semantics<parallel>, #tpu.dimension_semantics<arbitrary>], iteration_bounds = array<i64: 2, 1, 2>, scalar_prefetch = 1 : i64, scratch_operands = 3 : i64, tpu.core_type = #tpu.core_type<tc>, window_params = [{}, {transform_indices = @transform_1, window_bounds = array<i64: 8, 128>}, {transform_indices = @transform_2, window_bounds = array<i64: 128, 512>}, {transform_indices = @transform_3, window_bounds = array<i64: 1, 512>}, {transform_indices = @transform_4, window_bounds = array<i64: 1, 8, 512>}]} {
    %c0_i32 = arith.constant 0 : i32
    %0 = arith.cmpi eq, %arg2, %c0_i32 : i32
    %1 = arith.extui %0 : i1 to i32
    %c0_i32_0 = arith.constant 0 : i32
    %2 = arith.cmpi ne, %1, %c0_i32_0 : i32
    scf.if %2 {
      %c8_i32 = arith.constant 8 : i32
      %12 = arith.muli %arg1, %c8_i32 : i32
      %c0_i32_9 = arith.constant 0 : i32
      %13 = arith.addi %12, %c0_i32_9 : i32
      %14 = arith.index_cast %arg0 : i32 to index
      %15 = arith.index_cast %13 : i32 to index
      %16 = memref.load %arg3[%14, %15] : memref<2x8xi32, #tpu.memory_space<smem>>
      %c0_i32_10 = arith.constant 0 : i32
      %c0_i32_11 = arith.constant 0 : i32
      %17 = tpu.memref_slice %arg4[%16, %c0_i32_11] : memref<1024x128xf32, #tpu.memory_space<any>> -> memref<1x128xf32, #tpu.memory_space<any>>
      %c0_i32_12 = arith.constant 0 : i32
      %c0_i32_13 = arith.constant 0 : i32
      %18 = tpu.memref_slice %arg9[%c0_i32_12, %c0_i32_13] : memref<8x128xf32, #tpu.memory_space<vmem>> -> memref<1x128xf32, #tpu.memory_space<vmem>>
      %19 = tpu.memref_slice %arg11[%c0_i32_10] : memref<8x!tpu.dma_semaphore, #tpu.memory_space<semaphore_mem>> -> memref<1x!tpu.dma_semaphore, #tpu.memory_space<semaphore_mem>>
      %20 = tpu.memref_squeeze %19 : memref<1x!tpu.dma_semaphore, #tpu.memory_space<semaphore_mem>> -> memref<!tpu.dma_semaphore, #tpu.memory_space<semaphore_mem>>
      tpu.enqueue_dma source(%17 : memref<1x128xf32, #tpu.memory_space<any>>) target(%18 : memref<1x128xf32, #tpu.memory_space<vmem>>) target_semaphore(%20 : memref<!tpu.dma_semaphore, #tpu.memory_space<semaphore_mem>>)
      %c8_i32_14 = arith.constant 8 : i32
      %21 = arith.muli %arg1, %c8_i32_14 : i32
      %c1_i32 = arith.constant 1 : i32
      %22 = arith.addi %21, %c1_i32 : i32
      %23 = arith.index_cast %arg0 : i32 to index
      %24 = arith.index_cast %22 : i32 to index
      %25 = memref.load %arg3[%23, %24] : memref<2x8xi32, #tpu.memory_space<smem>>
      %c1_i32_15 = arith.constant 1 : i32
      %c0_i32_16 = arith.constant 0 : i32
      %26 = tpu.memref_slice %arg4[%25, %c0_i32_16] : memref<1024x128xf32, #tpu.memory_space<any>> -> memref<1x128xf32, #tpu.memory_space<any>>
      %c1_i32_17 = arith.constant 1 : i32
      %c0_i32_18 = arith.constant 0 : i32
      %27 = tpu.memref_slice %arg9[%c1_i32_17, %c0_i32_18] : memref<8x128xf32, #tpu.memory_space<vmem>> -> memref<1x128xf32, #tpu.memory_space<vmem>>
      %28 = tpu.memref_slice %arg11[%c1_i32_15] : memref<8x!tpu.dma_semaphore, #tpu.memory_space<semaphore_mem>> -> memref<1x!tpu.dma_semaphore, #tpu.memory_space<semaphore_mem>>
      %29 = tpu.memref_squeeze %28 : memref<1x!tpu.dma_semaphore, #tpu.memory_space<semaphore_mem>> -> memref<!tpu.dma_semaphore, #tpu.memory_space<semaphore_mem>>
      tpu.enqueue_dma source(%26 : memref<1x128xf32, #tpu.memory_space<any>>) target(%27 : memref<1x128xf32, #tpu.memory_space<vmem>>) target_semaphore(%29 : memref<!tpu.dma_semaphore, #tpu.memory_space<semaphore_mem>>)
      %c8_i32_19 = arith.constant 8 : i32
      %30 = arith.muli %arg1, %c8_i32_19 : i32
      %c2_i32 = arith.constant 2 : i32
      %31 = arith.addi %30, %c2_i32 : i32
      %32 = arith.index_cast %arg0 : i32 to index
      %33 = arith.index_cast %31 : i32 to index
      %34 = memref.load %arg3[%32, %33] : memref<2x8xi32, #tpu.memory_space<smem>>
      %c2_i32_20 = arith.constant 2 : i32
      %c0_i32_21 = arith.constant 0 : i32
      %35 = tpu.memref_slice %arg4[%34, %c0_i32_21] : memref<1024x128xf32, #tpu.memory_space<any>> -> memref<1x128xf32, #tpu.memory_space<any>>
      %c2_i32_22 = arith.constant 2 : i32
      %c0_i32_23 = arith.constant 0 : i32
      %36 = tpu.memref_slice %arg9[%c2_i32_22, %c0_i32_23] : memref<8x128xf32, #tpu.memory_space<vmem>> -> memref<1x128xf32, #tpu.memory_space<vmem>>
      %37 = tpu.memref_slice %arg11[%c2_i32_20] : memref<8x!tpu.dma_semaphore, #tpu.memory_space<semaphore_mem>> -> memref<1x!tpu.dma_semaphore, #tpu.memory_space<semaphore_mem>>
      %38 = tpu.memref_squeeze %37 : memref<1x!tpu.dma_semaphore, #tpu.memory_space<semaphore_mem>> -> memref<!tpu.dma_semaphore, #tpu.memory_space<semaphore_mem>>
      tpu.enqueue_dma source(%35 : memref<1x128xf32, #tpu.memory_space<any>>) target(%36 : memref<1x128xf32, #tpu.memory_space<vmem>>) target_semaphore(%38 : memref<!tpu.dma_semaphore, #tpu.memory_space<semaphore_mem>>)
      %c8_i32_24 = arith.constant 8 : i32
      %39 = arith.muli %arg1, %c8_i32_24 : i32
      %c3_i32 = arith.constant 3 : i32
      %40 = arith.addi %39, %c3_i32 : i32
      %41 = arith.index_cast %arg0 : i32 to index
      %42 = arith.index_cast %40 : i32 to index
      %43 = memref.load %arg3[%41, %42] : memref<2x8xi32, #tpu.memory_space<smem>>
      %c3_i32_25 = arith.constant 3 : i32
      %c0_i32_26 = arith.constant 0 : i32
      %44 = tpu.memref_slice %arg4[%43, %c0_i32_26] : memref<1024x128xf32, #tpu.memory_space<any>> -> memref<1x128xf32, #tpu.memory_space<any>>
      %c3_i32_27 = arith.constant 3 : i32
      %c0_i32_28 = arith.constant 0 : i32
      %45 = tpu.memref_slice %arg9[%c3_i32_27, %c0_i32_28] : memref<8x128xf32, #tpu.memory_space<vmem>> -> memref<1x128xf32, #tpu.memory_space<vmem>>
      %46 = tpu.memref_slice %arg11[%c3_i32_25] : memref<8x!tpu.dma_semaphore, #tpu.memory_space<semaphore_mem>> -> memref<1x!tpu.dma_semaphore, #tpu.memory_space<semaphore_mem>>
      %47 = tpu.memref_squeeze %46 : memref<1x!tpu.dma_semaphore, #tpu.memory_space<semaphore_mem>> -> memref<!tpu.dma_semaphore, #tpu.memory_space<semaphore_mem>>
      tpu.enqueue_dma source(%44 : memref<1x128xf32, #tpu.memory_space<any>>) target(%45 : memref<1x128xf32, #tpu.memory_space<vmem>>) target_semaphore(%47 : memref<!tpu.dma_semaphore, #tpu.memory_space<semaphore_mem>>)
      %c8_i32_29 = arith.constant 8 : i32
      %48 = arith.muli %arg1, %c8_i32_29 : i32
      %c4_i32 = arith.constant 4 : i32
      %49 = arith.addi %48, %c4_i32 : i32
      %50 = arith.index_cast %arg0 : i32 to index
      %51 = arith.index_cast %49 : i32 to index
      %52 = memref.load %arg3[%50, %51] : memref<2x8xi32, #tpu.memory_space<smem>>
      %c4_i32_30 = arith.constant 4 : i32
      %c0_i32_31 = arith.constant 0 : i32
      %53 = tpu.memref_slice %arg4[%52, %c0_i32_31] : memref<1024x128xf32, #tpu.memory_space<any>> -> memref<1x128xf32, #tpu.memory_space<any>>
      %c4_i32_32 = arith.constant 4 : i32
      %c0_i32_33 = arith.constant 0 : i32
      %54 = tpu.memref_slice %arg9[%c4_i32_32, %c0_i32_33] : memref<8x128xf32, #tpu.memory_space<vmem>> -> memref<1x128xf32, #tpu.memory_space<vmem>>
      %55 = tpu.memref_slice %arg11[%c4_i32_30] : memref<8x!tpu.dma_semaphore, #tpu.memory_space<semaphore_mem>> -> memref<1x!tpu.dma_semaphore, #tpu.memory_space<semaphore_mem>>
      %56 = tpu.memref_squeeze %55 : memref<1x!tpu.dma_semaphore, #tpu.memory_space<semaphore_mem>> -> memref<!tpu.dma_semaphore, #tpu.memory_space<semaphore_mem>>
      tpu.enqueue_dma source(%53 : memref<1x128xf32, #tpu.memory_space<any>>) target(%54 : memref<1x128xf32, #tpu.memory_space<vmem>>) target_semaphore(%56 : memref<!tpu.dma_semaphore, #tpu.memory_space<semaphore_mem>>)
      %c8_i32_34 = arith.constant 8 : i32
      %57 = arith.muli %arg1, %c8_i32_34 : i32
      %c5_i32 = arith.constant 5 : i32
      %58 = arith.addi %57, %c5_i32 : i32
      %59 = arith.index_cast %arg0 : i32 to index
      %60 = arith.index_cast %58 : i32 to index
      %61 = memref.load %arg3[%59, %60] : memref<2x8xi32, #tpu.memory_space<smem>>
      %c5_i32_35 = arith.constant 5 : i32
      %c0_i32_36 = arith.constant 0 : i32
      %62 = tpu.memref_slice %arg4[%61, %c0_i32_36] : memref<1024x128xf32, #tpu.memory_space<any>> -> memref<1x128xf32, #tpu.memory_space<any>>
      %c5_i32_37 = arith.constant 5 : i32
      %c0_i32_38 = arith.constant 0 : i32
      %63 = tpu.memref_slice %arg9[%c5_i32_37, %c0_i32_38] : memref<8x128xf32, #tpu.memory_space<vmem>> -> memref<1x128xf32, #tpu.memory_space<vmem>>
      %64 = tpu.memref_slice %arg11[%c5_i32_35] : memref<8x!tpu.dma_semaphore, #tpu.memory_space<semaphore_mem>> -> memref<1x!tpu.dma_semaphore, #tpu.memory_space<semaphore_mem>>
      %65 = tpu.memref_squeeze %64 : memref<1x!tpu.dma_semaphore, #tpu.memory_space<semaphore_mem>> -> memref<!tpu.dma_semaphore, #tpu.memory_space<semaphore_mem>>
      tpu.enqueue_dma source(%62 : memref<1x128xf32, #tpu.memory_space<any>>) target(%63 : memref<1x128xf32, #tpu.memory_space<vmem>>) target_semaphore(%65 : memref<!tpu.dma_semaphore, #tpu.memory_space<semaphore_mem>>)
      %c8_i32_39 = arith.constant 8 : i32
      %66 = arith.muli %arg1, %c8_i32_39 : i32
      %c6_i32 = arith.constant 6 : i32
      %67 = arith.addi %66, %c6_i32 : i32
      %68 = arith.index_cast %arg0 : i32 to index
      %69 = arith.index_cast %67 : i32 to index
      %70 = memref.load %arg3[%68, %69] : memref<2x8xi32, #tpu.memory_space<smem>>
      %c6_i32_40 = arith.constant 6 : i32
      %c0_i32_41 = arith.constant 0 : i32
      %71 = tpu.memref_slice %arg4[%70, %c0_i32_41] : memref<1024x128xf32, #tpu.memory_space<any>> -> memref<1x128xf32, #tpu.memory_space<any>>
      %c6_i32_42 = arith.constant 6 : i32
      %c0_i32_43 = arith.constant 0 : i32
      %72 = tpu.memref_slice %arg9[%c6_i32_42, %c0_i32_43] : memref<8x128xf32, #tpu.memory_space<vmem>> -> memref<1x128xf32, #tpu.memory_space<vmem>>
      %73 = tpu.memref_slice %arg11[%c6_i32_40] : memref<8x!tpu.dma_semaphore, #tpu.memory_space<semaphore_mem>> -> memref<1x!tpu.dma_semaphore, #tpu.memory_space<semaphore_mem>>
      %74 = tpu.memref_squeeze %73 : memref<1x!tpu.dma_semaphore, #tpu.memory_space<semaphore_mem>> -> memref<!tpu.dma_semaphore, #tpu.memory_space<semaphore_mem>>
      tpu.enqueue_dma source(%71 : memref<1x128xf32, #tpu.memory_space<any>>) target(%72 : memref<1x128xf32, #tpu.memory_space<vmem>>) target_semaphore(%74 : memref<!tpu.dma_semaphore, #tpu.memory_space<semaphore_mem>>)
      %c8_i32_44 = arith.constant 8 : i32
      %75 = arith.muli %arg1, %c8_i32_44 : i32
      %c7_i32 = arith.constant 7 : i32
      %76 = arith.addi %75, %c7_i32 : i32
      %77 = arith.index_cast %arg0 : i32 to index
      %78 = arith.index_cast %76 : i32 to index
      %79 = memref.load %arg3[%77, %78] : memref<2x8xi32, #tpu.memory_space<smem>>
      %c7_i32_45 = arith.constant 7 : i32
      %c0_i32_46 = arith.constant 0 : i32
      %80 = tpu.memref_slice %arg4[%79, %c0_i32_46] : memref<1024x128xf32, #tpu.memory_space<any>> -> memref<1x128xf32, #tpu.memory_space<any>>
      %c7_i32_47 = arith.constant 7 : i32
      %c0_i32_48 = arith.constant 0 : i32
      %81 = tpu.memref_slice %arg9[%c7_i32_47, %c0_i32_48] : memref<8x128xf32, #tpu.memory_space<vmem>> -> memref<1x128xf32, #tpu.memory_space<vmem>>
      %82 = tpu.memref_slice %arg11[%c7_i32_45] : memref<8x!tpu.dma_semaphore, #tpu.memory_space<semaphore_mem>> -> memref<1x!tpu.dma_semaphore, #tpu.memory_space<semaphore_mem>>
      %83 = tpu.memref_squeeze %82 : memref<1x!tpu.dma_semaphore, #tpu.memory_space<semaphore_mem>> -> memref<!tpu.dma_semaphore, #tpu.memory_space<semaphore_mem>>
      tpu.enqueue_dma source(%80 : memref<1x128xf32, #tpu.memory_space<any>>) target(%81 : memref<1x128xf32, #tpu.memory_space<vmem>>) target_semaphore(%83 : memref<!tpu.dma_semaphore, #tpu.memory_space<semaphore_mem>>)
      %c0_i32_49 = arith.constant 0 : i32
      %c0_i32_50 = arith.constant 0 : i32
      %c0_i32_51 = arith.constant 0 : i32
      %84 = tpu.memref_slice %arg4[%c0_i32_50, %c0_i32_51] : memref<1024x128xf32, #tpu.memory_space<any>> -> memref<1x128xf32, #tpu.memory_space<any>>
      %c0_i32_52 = arith.constant 0 : i32
      %c0_i32_53 = arith.constant 0 : i32
      %85 = tpu.memref_slice %arg9[%c0_i32_52, %c0_i32_53] : memref<8x128xf32, #tpu.memory_space<vmem>> -> memref<1x128xf32, #tpu.memory_space<vmem>>
      %86 = tpu.memref_slice %arg11[%c0_i32_49] : memref<8x!tpu.dma_semaphore, #tpu.memory_space<semaphore_mem>> -> memref<1x!tpu.dma_semaphore, #tpu.memory_space<semaphore_mem>>
      %87 = tpu.memref_squeeze %86 : memref<1x!tpu.dma_semaphore, #tpu.memory_space<semaphore_mem>> -> memref<!tpu.dma_semaphore, #tpu.memory_space<semaphore_mem>>
      tpu.wait_dma2 semaphore(%87 : memref<!tpu.dma_semaphore, #tpu.memory_space<semaphore_mem>>) src(%84 : memref<1x128xf32, #tpu.memory_space<any>>) dst(%85 : memref<1x128xf32, #tpu.memory_space<vmem>>)
      %c1_i32_54 = arith.constant 1 : i32
      %c0_i32_55 = arith.constant 0 : i32
      %c0_i32_56 = arith.constant 0 : i32
      %88 = tpu.memref_slice %arg4[%c0_i32_55, %c0_i32_56] : memref<1024x128xf32, #tpu.memory_space<any>> -> memref<1x128xf32, #tpu.memory_space<any>>
      %c1_i32_57 = arith.constant 1 : i32
      %c0_i32_58 = arith.constant 0 : i32
      %89 = tpu.memref_slice %arg9[%c1_i32_57, %c0_i32_58] : memref<8x128xf32, #tpu.memory_space<vmem>> -> memref<1x128xf32, #tpu.memory_space<vmem>>
      %90 = tpu.memref_slice %arg11[%c1_i32_54] : memref<8x!tpu.dma_semaphore, #tpu.memory_space<semaphore_mem>> -> memref<1x!tpu.dma_semaphore, #tpu.memory_space<semaphore_mem>>
      %91 = tpu.memref_squeeze %90 : memref<1x!tpu.dma_semaphore, #tpu.memory_space<semaphore_mem>> -> memref<!tpu.dma_semaphore, #tpu.memory_space<semaphore_mem>>
      tpu.wait_dma2 semaphore(%91 : memref<!tpu.dma_semaphore, #tpu.memory_space<semaphore_mem>>) src(%88 : memref<1x128xf32, #tpu.memory_space<any>>) dst(%89 : memref<1x128xf32, #tpu.memory_space<vmem>>)
      %c2_i32_59 = arith.constant 2 : i32
      %c0_i32_60 = arith.constant 0 : i32
      %c0_i32_61 = arith.constant 0 : i32
      %92 = tpu.memref_slice %arg4[%c0_i32_60, %c0_i32_61] : memref<1024x128xf32, #tpu.memory_space<any>> -> memref<1x128xf32, #tpu.memory_space<any>>
      %c2_i32_62 = arith.constant 2 : i32
      %c0_i32_63 = arith.constant 0 : i32
      %93 = tpu.memref_slice %arg9[%c2_i32_62, %c0_i32_63] : memref<8x128xf32, #tpu.memory_space<vmem>> -> memref<1x128xf32, #tpu.memory_space<vmem>>
      %94 = tpu.memref_slice %arg11[%c2_i32_59] : memref<8x!tpu.dma_semaphore, #tpu.memory_space<semaphore_mem>> -> memref<1x!tpu.dma_semaphore, #tpu.memory_space<semaphore_mem>>
      %95 = tpu.memref_squeeze %94 : memref<1x!tpu.dma_semaphore, #tpu.memory_space<semaphore_mem>> -> memref<!tpu.dma_semaphore, #tpu.memory_space<semaphore_mem>>
      tpu.wait_dma2 semaphore(%95 : memref<!tpu.dma_semaphore, #tpu.memory_space<semaphore_mem>>) src(%92 : memref<1x128xf32, #tpu.memory_space<any>>) dst(%93 : memref<1x128xf32, #tpu.memory_space<vmem>>)
      %c3_i32_64 = arith.constant 3 : i32
      %c0_i32_65 = arith.constant 0 : i32
      %c0_i32_66 = arith.constant 0 : i32
      %96 = tpu.memref_slice %arg4[%c0_i32_65, %c0_i32_66] : memref<1024x128xf32, #tpu.memory_space<any>> -> memref<1x128xf32, #tpu.memory_space<any>>
      %c3_i32_67 = arith.constant 3 : i32
      %c0_i32_68 = arith.constant 0 : i32
      %97 = tpu.memref_slice %arg9[%c3_i32_67, %c0_i32_68] : memref<8x128xf32, #tpu.memory_space<vmem>> -> memref<1x128xf32, #tpu.memory_space<vmem>>
      %98 = tpu.memref_slice %arg11[%c3_i32_64] : memref<8x!tpu.dma_semaphore, #tpu.memory_space<semaphore_mem>> -> memref<1x!tpu.dma_semaphore, #tpu.memory_space<semaphore_mem>>
      %99 = tpu.memref_squeeze %98 : memref<1x!tpu.dma_semaphore, #tpu.memory_space<semaphore_mem>> -> memref<!tpu.dma_semaphore, #tpu.memory_space<semaphore_mem>>
      tpu.wait_dma2 semaphore(%99 : memref<!tpu.dma_semaphore, #tpu.memory_space<semaphore_mem>>) src(%96 : memref<1x128xf32, #tpu.memory_space<any>>) dst(%97 : memref<1x128xf32, #tpu.memory_space<vmem>>)
      %c4_i32_69 = arith.constant 4 : i32
      %c0_i32_70 = arith.constant 0 : i32
      %c0_i32_71 = arith.constant 0 : i32
      %100 = tpu.memref_slice %arg4[%c0_i32_70, %c0_i32_71] : memref<1024x128xf32, #tpu.memory_space<any>> -> memref<1x128xf32, #tpu.memory_space<any>>
      %c4_i32_72 = arith.constant 4 : i32
      %c0_i32_73 = arith.constant 0 : i32
      %101 = tpu.memref_slice %arg9[%c4_i32_72, %c0_i32_73] : memref<8x128xf32, #tpu.memory_space<vmem>> -> memref<1x128xf32, #tpu.memory_space<vmem>>
      %102 = tpu.memref_slice %arg11[%c4_i32_69] : memref<8x!tpu.dma_semaphore, #tpu.memory_space<semaphore_mem>> -> memref<1x!tpu.dma_semaphore, #tpu.memory_space<semaphore_mem>>
      %103 = tpu.memref_squeeze %102 : memref<1x!tpu.dma_semaphore, #tpu.memory_space<semaphore_mem>> -> memref<!tpu.dma_semaphore, #tpu.memory_space<semaphore_mem>>
      tpu.wait_dma2 semaphore(%103 : memref<!tpu.dma_semaphore, #tpu.memory_space<semaphore_mem>>) src(%100 : memref<1x128xf32, #tpu.memory_space<any>>) dst(%101 : memref<1x128xf32, #tpu.memory_space<vmem>>)
      %c5_i32_74 = arith.constant 5 : i32
      %c0_i32_75 = arith.constant 0 : i32
      %c0_i32_76 = arith.constant 0 : i32
      %104 = tpu.memref_slice %arg4[%c0_i32_75, %c0_i32_76] : memref<1024x128xf32, #tpu.memory_space<any>> -> memref<1x128xf32, #tpu.memory_space<any>>
      %c5_i32_77 = arith.constant 5 : i32
      %c0_i32_78 = arith.constant 0 : i32
      %105 = tpu.memref_slice %arg9[%c5_i32_77, %c0_i32_78] : memref<8x128xf32, #tpu.memory_space<vmem>> -> memref<1x128xf32, #tpu.memory_space<vmem>>
      %106 = tpu.memref_slice %arg11[%c5_i32_74] : memref<8x!tpu.dma_semaphore, #tpu.memory_space<semaphore_mem>> -> memref<1x!tpu.dma_semaphore, #tpu.memory_space<semaphore_mem>>
      %107 = tpu.memref_squeeze %106 : memref<1x!tpu.dma_semaphore, #tpu.memory_space<semaphore_mem>> -> memref<!tpu.dma_semaphore, #tpu.memory_space<semaphore_mem>>
      tpu.wait_dma2 semaphore(%107 : memref<!tpu.dma_semaphore, #tpu.memory_space<semaphore_mem>>) src(%104 : memref<1x128xf32, #tpu.memory_space<any>>) dst(%105 : memref<1x128xf32, #tpu.memory_space<vmem>>)
      %c6_i32_79 = arith.constant 6 : i32
      %c0_i32_80 = arith.constant 0 : i32
      %c0_i32_81 = arith.constant 0 : i32
      %108 = tpu.memref_slice %arg4[%c0_i32_80, %c0_i32_81] : memref<1024x128xf32, #tpu.memory_space<any>> -> memref<1x128xf32, #tpu.memory_space<any>>
      %c6_i32_82 = arith.constant 6 : i32
      %c0_i32_83 = arith.constant 0 : i32
      %109 = tpu.memref_slice %arg9[%c6_i32_82, %c0_i32_83] : memref<8x128xf32, #tpu.memory_space<vmem>> -> memref<1x128xf32, #tpu.memory_space<vmem>>
      %110 = tpu.memref_slice %arg11[%c6_i32_79] : memref<8x!tpu.dma_semaphore, #tpu.memory_space<semaphore_mem>> -> memref<1x!tpu.dma_semaphore, #tpu.memory_space<semaphore_mem>>
      %111 = tpu.memref_squeeze %110 : memref<1x!tpu.dma_semaphore, #tpu.memory_space<semaphore_mem>> -> memref<!tpu.dma_semaphore, #tpu.memory_space<semaphore_mem>>
      tpu.wait_dma2 semaphore(%111 : memref<!tpu.dma_semaphore, #tpu.memory_space<semaphore_mem>>) src(%108 : memref<1x128xf32, #tpu.memory_space<any>>) dst(%109 : memref<1x128xf32, #tpu.memory_space<vmem>>)
      %c7_i32_84 = arith.constant 7 : i32
      %c0_i32_85 = arith.constant 0 : i32
      %c0_i32_86 = arith.constant 0 : i32
      %112 = tpu.memref_slice %arg4[%c0_i32_85, %c0_i32_86] : memref<1024x128xf32, #tpu.memory_space<any>> -> memref<1x128xf32, #tpu.memory_space<any>>
      %c7_i32_87 = arith.constant 7 : i32
      %c0_i32_88 = arith.constant 0 : i32
      %113 = tpu.memref_slice %arg9[%c7_i32_87, %c0_i32_88] : memref<8x128xf32, #tpu.memory_space<vmem>> -> memref<1x128xf32, #tpu.memory_space<vmem>>
      %114 = tpu.memref_slice %arg11[%c7_i32_84] : memref<8x!tpu.dma_semaphore, #tpu.memory_space<semaphore_mem>> -> memref<1x!tpu.dma_semaphore, #tpu.memory_space<semaphore_mem>>
      %115 = tpu.memref_squeeze %114 : memref<1x!tpu.dma_semaphore, #tpu.memory_space<semaphore_mem>> -> memref<!tpu.dma_semaphore, #tpu.memory_space<semaphore_mem>>
      tpu.wait_dma2 semaphore(%115 : memref<!tpu.dma_semaphore, #tpu.memory_space<semaphore_mem>>) src(%112 : memref<1x128xf32, #tpu.memory_space<any>>) dst(%113 : memref<1x128xf32, #tpu.memory_space<vmem>>)
      %c0_89 = arith.constant 0 : index
      %c0_90 = arith.constant 0 : index
      %116 = vector.load %arg9[%c0_89, %c0_90] : memref<8x128xf32, #tpu.memory_space<vmem>>, vector<8x128xf32>
      %cst_91 = arith.constant 11.3137083 : f32
      %117 = vector.broadcast %cst_91 : f32 to vector<8x128xf32>
      %118 = arith.mulf %116, %117 : vector<8x128xf32>
      %c0_92 = arith.constant 0 : index
      %c0_93 = arith.constant 0 : index
      %119 = vector.load %arg5[%c0_92, %c0_93] : memref<8x128xf32, #tpu.memory_space<vmem>>, vector<8x128xf32>
      %120 = arith.addf %118, %119 : vector<8x128xf32>
      %121 = arith.truncf %120 : vector<8x128xf32> to vector<8x128xbf16>
      %c0_94 = arith.constant 0 : index
      %c0_95 = arith.constant 0 : index
      %122 = vector.load %arg10[%c0_94, %c0_95] : memref<8x128xbf16, #tpu.memory_space<vmem>>, vector<8x128xbf16>
      tpu.vector_store %arg10[%c0_94, %c0_95], %121 {strides = array<i32>} : memref<8x128xbf16, #tpu.memory_space<vmem>>, vector<8x128xbf16>,
    } else {
    }
    %c0 = arith.constant 0 : index
    %c0_1 = arith.constant 0 : index
    %3 = vector.load %arg10[%c0, %c0_1] : memref<8x128xbf16, #tpu.memory_space<vmem>>, vector<8x128xbf16>
    %c0_2 = arith.constant 0 : index
    %c0_3 = arith.constant 0 : index
    %4 = vector.load %arg6[%c0_2, %c0_3] : memref<128x512xbf16, #tpu.memory_space<vmem>>, vector<128x512xbf16>
    %cst = arith.constant dense<0.000000e+00> : vector<8x512xf32>
    %5 = tpu.matmul %3, %4, %cst {dimension_numbers = #tpu.dot_dimension_numbers<[1], [0], [0], [1], [0, 0, 1, 1], [], []>} : vector<8x128xbf16>, vector<128x512xbf16>, vector<8x512xf32> -> vector<8x512xf32>
    %c0_4 = arith.constant 0 : index
    %c0_5 = arith.constant 0 : index
    %6 = vector.load %arg7[%c0_4, %c0_5] : memref<1x512xf32, #tpu.memory_space<vmem>>, vector<1x512xf32>
    %7 = vector.broadcast %6 : vector<1x512xf32> to vector<8x512xf32>
    %8 = arith.addf %5, %7 : vector<8x512xf32>
    %c0_6 = arith.constant 0 : index
    %c0_7 = arith.constant 0 : index
    %c0_8 = arith.constant 0 : index
    %9 = vector.load %arg8[%c0_6, %c0_7, %c0_8] : memref<1x8x512xf32, #tpu.memory_space<vmem>>, vector<1x8x512xf32>
    %10 = vector.shape_cast %9 : vector<1x8x512xf32> to vector<8x512xf32>
    %11 = vector.shape_cast %8 : vector<8x512xf32> to vector<1x8x512xf32>
    tpu.vector_store %arg8[%c0_6, %c0_7, %c0_8], %11 {strides = array<i32>} : memref<1x8x512xf32, #tpu.memory_space<vmem>>, vector<1x8x512xf32>,
    return
  }
  func.func @transform_1(%arg0: i32, %arg1: i32, %arg2: i32, %arg3: memref<2x8xi32, #tpu.memory_space<smem>>) -> (i32, i32) {
    %c0_i32 = arith.constant 0 : i32
    %c0_i32_0 = arith.constant 0 : i32
    return %arg1, %c0_i32 : i32, i32
  }
  func.func @transform_2(%arg0: i32, %arg1: i32, %arg2: i32, %arg3: memref<2x8xi32, #tpu.memory_space<smem>>) -> (i32, i32) {
    %c0_i32 = arith.constant 0 : i32
    %c0_i32_0 = arith.constant 0 : i32
    return %c0_i32, %arg2 : i32, i32
  }
  func.func @transform_3(%arg0: i32, %arg1: i32, %arg2: i32, %arg3: memref<2x8xi32, #tpu.memory_space<smem>>) -> (i32, i32) {
    %c0_i32 = arith.constant 0 : i32
    %c0_i32_0 = arith.constant 0 : i32
    return %c0_i32, %arg2 : i32, i32
  }
  func.func @transform_4(%arg0: i32, %arg1: i32, %arg2: i32, %arg3: memref<2x8xi32, #tpu.memory_space<smem>>) -> (i32, i32, i32) {
    %c0_i32 = arith.constant 0 : i32
    return %arg0, %arg1, %arg2 : i32, i32, i32
  }
}

</mosaic_0001>

<bundles_post_ra>
// kernel: tpu_custom_call.1
= control target key start
LH: loop header
LB: loop body
LE: loop exit
PB: predicated region body
PF: predicated region fallthrough
CT: control target
= control target key end

     0   :  { %s1678_s18 = smov [#allocation6]   ;;  %s2156_s0 = inlined_call_operand.hbm [shape: s32[2,8], index: 0, kind: input, shape index: {}]   ;;  %s2157_s1 = inlined_call_operand.hbm [shape: f32[1024,128], index: 1, kind: input, shape index: {}]   ;;  %s2158_s2 = inlined_call_operand.hbm [shape: f32[8,128], index: 2, kind: input, shape index: {}]   ;;  %s2159_s3 = inlined_call_operand.hbm [shape: bf16[128,1024], index: 3, kind: input, shape index: {}]   ;;  %s2160_s4 = inlined_call_operand.hbm [shape: f32[1,1024], index: 4, kind: input, shape index: {}]   ;;  %s2161_s5 = inlined_call_operand.hbm [shape: f32[2,8,1024], index: 5, kind: output, shape index: {}]  }
   0x1   :  { %2176 = sst [smem:[#allocation54_spill]] %s2158_s2 }
   0x2   :  { %2177 = sst [smem:[#allocation55_spill]] %s2159_s3 }
   0x3   :  { %2178 = sst [smem:[#allocation56_spill]] %s2160_s4 }
   0x4   :  { %11 = dma.hbm_to_smem %s2156_s0, 32, %s1678_s18, [#allocation5] }
   0x5   :  { %1604 = dma.done.wait [#allocation5], 32 }
   0x6   :  { %1605 = vsyncadd [#allocation5], 4294967264 }
   0x7   :  { %13 = sfence }
   0x8   :  { %14 = vsyncpa [#allocation8], 0 }
   0x9   :  { %15 = vsyncpa [#allocation11], 0 }
   0xa   :  { %17 = vsyncpa [#allocation11 + $0x1], 0 }
   0xb   :  { %18 = vsyncpa [#allocation9], 0 }
   0xc   :  { %20 = vsyncpa [#allocation9 + $0x1], 0  ;;  %s1728_s21 = smov 0   ;;  %s1730_s22 = smov 0  }
   0xd   :  { %s1732_s23 = smov 0   ;;  %s1734_s24 = smov 0  }
   0xe   :  { %s1736_s25 = smov 0   ;;  %s1738_s26 = smov 0  }
   0xf   :  { %s1740_s0 = smov 0   ;;  %s1742_s27 = smov 0  }
  0x10   :  { %s1744_s28 = smov 0   ;;  %s1746_s29 = smov 0  }
  0x11   :  { %s1748_s30 = smov 0  }
  0x12 LB: > { %2179 = sst [smem:[#allocation44_spill]] %s1644_s23  ;;  %s38_s6 = sadd.s32 1, %s1668_s28  ;;  %s1676_s30 = sphi %s1748_s30, %s26_s30   ;;  %s1672_s29 = sphi %s1746_s29, %s2217_s29   ;;  %s1668_s28 = sphi %s1744_s28, %s2216_s28   ;;  %s1664_s27 = sphi %s1742_s27, %s2215_s27   ;;  %s1660_s0 = sphi %s1740_s0, %s2214_s0   ;;  %s1656_s26 = sphi %s1738_s26, %s2213_s26   ;;  %s1652_s25 = sphi %s1736_s25, %s2212_s25   ;;  %s1648_s24 = sphi %s1734_s24, %s2220_s24   ;;  %s1644_s23 = sphi %s1732_s23, %s2210_s23   ;;  %s1640_s22 = sphi %s1730_s22, %s2219_s22   ;;  %s1636_s21 = sphi %s1728_s21, %s2218_s21  }
  0x13   : > { %2180 = sst [smem:[#allocation45_spill]] %s1652_s25  ;;  %s45_s7 = sadd.s32 1, %s1672_s29 }
  0x14   : > { %2181 = sst [smem:[#allocation46_spill]] %s1656_s26  ;;  %p39_p0 = scmp.ge.s32.totalorder %s38_s6, 2 }
  0x15   : > { %2182 = sst [smem:[#allocation47_spill]] %s1668_s28  ;;  %s78_s8 = sadd.s32 1, %s1656_s26 }
  0x16   : > { %2183 = sst [smem:[#allocation48_spill]] %s1672_s29  ;;  %p85_p1 = scmp.ne.s32.totalorder %s1656_s26, %s1652_s25 }
  0x17   : > { %p86_p2 = scmp.eq.s32.totalorder %s1676_s30, 0  ;;  %s2222_s6 = smov (%p39_p0, %s38_s6), 0 }
  0x18   : > { %2184 = sst [smem:[#allocation49_spill]] %s2222_s6  ;;  %s2224_s7 = smov (!%p39_p0, %s45_s7), %s1672_s29 }
  0x19   : > { %s75_s9 = ssub.s32 %s1668_s28, %s2222_s6  ;;  %p1794_p3 = por %p86_p2, %p85_p1 }
  0x1a   : > { %p47_p4 = scmp.ge.s32.totalorder %s2224_s7, 2  ;;  %p76_p5 = scmp.eq.s32.totalorder %s75_s9, 0 }
  0x1b   : > { %p1115_p6 = scmp.lt.s32.totalorder %s1676_s30, 4  ;;  %s184_s13 = sand.u32 1, %s1676_s30  }
  0x1c   : > { %s2226_s7 = smov (%p47_p4, %s2224_s7), 0  ;;  %s186_s15 = sand.u32 1, %s1656_s26  }
  0x1d   : > { %2186 = sst [smem:[#allocation50_spill]] %s2226_s7  ;;  %s127_s12 = ssub.s32 %s1672_s29, %s2226_s7 }
  0x1e   : > { %s1802_s11 = scalar_select %p76_p5, %s1656_s26, %s78_s8  }
  0x1f   : > { %s1807_s14 = sor.u32 %s127_s12, %s75_s9  ;;  %s1087_s16 = sshll.u32 %s1668_s28, 8 }
  0x20   : > { %2187 = sst [smem:[#allocation51_spill]] %s1802_s11  ;;  %s1013_s17 = sshll.u32 %s186_s15, 8 }
  0x21   : > { %s2188_s3 = sld [smem:[#allocation55_spill]]  ;;  %p1818_p7 = pnand %p1115_p6, %p1794_p3 }
  0x22   : > { %s188_s8 = scalar_lea.vmem [#allocation10], %s1013_s17  ;;  %s1822_s9 = scalar_lea.sflag [#allocation11], %s184_s13 }
  0x23   : > { %s195_s7 = sshll.u32 %s188_s8, 4  ;;  %p2166_p8 = pneg %p1818_p7  ;;  %s196_s7 = int_to_ptr.vmem [resolvable:$true] %s195_s7 }
  0x24   : > { %s1289_s12 = scalar_lea.vmem %s196_s7, 4096  ;;  %s1679_s10 = smov [#allocation10]  }
  0x25   : > { %p1290_p9 = scmp.ne.s32.totalorder %s196_s7, %s1289_s12 }
  0x27   : > { %s194_s20 = scalar_lea.hbm %s2188_s3, %s1087_s16  ;;  %p1292_p10 = pnand %p1290_p9, %p2166_p8 }
  0x28   : > { %s1294_s16 = sshll.u32 %s1679_s10, 4  ;;  %s1295_s16 = int_to_ptr.vmem [resolvable:$false] %s1294_s16 }
  0x29   : > { %p1293_p11 = pneg %p1292_p10  ;;  %s1296_s18 = scalar_lea.vmem %s1295_s16, 8192 }
  0x2a   : > { %p1297_p12 = scmp.lt.s32.totalorder %s196_s7, %s1295_s16  ;;  %p1298_p13 = scmp.lt.s32.totalorder %s1296_s18, %s1289_s12 }
  0x2c   : > { %p1299_p0 = por %p1298_p13, %p1297_p12 }
  0x2e   : > { %p1300_p1 = pnand %p1299_p0, %p1293_p11 }
  0x30   : > { %1303 = shalt.err (!%p1300_p1)
}
  0x31   : > { %s1680_s17 = smov 512   ;;  %s1681_s13 = smov 256  }
  0x32   : > { %s1682_s19 = smov 16   ;;  %s1833_s8 = sadd.s32 4294967295, %s1676_s30  }
  0x33   : > { %1106 = dma.hbm_to_vmem [thread:$0]  (!%p1818_p7), %s194_s20, 4096, %s196_s7, %s1822_s9, %s1680_s17, %s1681_s13, %s1682_s19  }
  0x34   : > { %s1009_s12 = sadd.s32 4294967294, %s1676_s30   ;;  %p91_p2 = scmp.ne.s32.totalorder %s1652_s25, %s1648_s24 }
  0x35   : > { %p2165_p3 = scmp.eq.s32.totalorder %s1833_s8, 0  ;;  %p132_p4 = scmp.eq.s32.totalorder %s1807_s14, 0 }
  0x36   : > { %s134_s10 = sadd.s32 1, %s1644_s23  ;;  %p144_p6 = scmp.ne.s32.totalorder %s1644_s23, %s1640_s22 }
  0x37   : > { %p1843_p5 = por %p2165_p3, %p91_p2  ;;  %p145_p9 = scmp.eq.s32.totalorder %s1833_s8, 3 }
  0x38   : > { %s1850_s7 = scalar_select %p132_p4, %s1644_s23, %s134_s10  }
  0x39   : > { %s2190_s16 = scalar_select %p1843_p5, 1, 0 }
  0x3a   : > { %2191 = sst [smem:[#allocation52_spill]] %s1850_s7  ;;  %p150_p10 = scmp.ne.s32.totalorder %s1640_s22, %s1636_s21 }
  0x3b   : > { %p151_p11 = scmp.eq.s32.totalorder %s1009_s12, 3  ;;  %p1010_p12 = scmp.ge.s32.totalorder %s1676_s30, 1 }
  0x3c   : > { %p1856_p13 = por %p145_p9, %p144_p6  ;;  %p158_p0 = scmp.lt.s32.totalorder %s1676_s30, 5 }
  0x3d   : > { %p1861_p1 = por %p151_p11, %p150_p10  ;;  %s1683_s18 = smov [#allocation7]  }
  0x3e   : > { %s2192_s24 = scalar_select %p1856_p13, 1, 0 }
  0x3f   : > { %s2193_s14 = scalar_select %p1861_p1, 1, 0 }
  0x40   : > { %p1865_p2 = pnand %p1010_p12, %p158_p0  ;;  %s173_s17 = sshll.u32 %s1683_s18, 4  ;;  %s174_s17 = int_to_ptr.vmem [resolvable:$true] %s173_s17 }
  0x41   : > { %2194 = sst [smem:[#allocation53_spill]] %s2193_s14  ;;  %s1016_s13 = sshll.u32 %s186_s15, 2 }
  0x42   : > { %s2195_s20 = scalar_select %p1865_p2, 1, 0 }
  0x43   : > { %p1099_p4 = pneg %p1865_p2  ;;  %s1088_s19 = sshll.u32 %s1668_s28, 6 }
  0x44   : > { %s2197_s4 = sld [smem:[#allocation56_spill]]  ;;  %s209_s11 = scalar_lea.vmem [#allocation12], %s1016_s13 }
  0x45   : > { %p1876_p6 = pnand %p1099_p4, %p2165_p3  ;;  %s217_s7 = sshll.u32 %s209_s11, 4  ;;  %s218_s7 = int_to_ptr.vmem [resolvable:$true] %s217_s7 }
  0x46   : > { %s1315_s15 = scalar_lea.vmem %s174_s17, 128  ;;  %p1323_p0 = scmp.lt.s32.totalorder %s174_s17, %s174_s17 }
  0x47   : > { %p1306_p9 = pneg %p1876_p6  ;;  %p1316_p10 = scmp.ne.s32.totalorder %s174_s17, %s1315_s15 }
  0x48   : > { %p1324_p4 = scmp.lt.s32.totalorder %s1315_s15, %s1315_s15 }
  0x49   : > { %p1318_p11 = pnand %p1316_p10, %p1306_p9 }
  0x4a   : > { %s1883_s29 = scalar_lea.hbm %s2197_s4, %s1088_s19  ;;  %p1325_p3 = por %p1324_p4, %p1323_p0 }
  0x4b   : > { %p1319_p12 = pneg %p1318_p11 }
  0x4d   : > { %p1326_p8 = pnand %p1325_p3, %p1319_p12 }
  0x4f   : > { %1329 = shalt.err (!%p1326_p8)
}
  0x50   : > { %s2198_s2 = sld [smem:[#allocation54_spill]]  ;;  %s1343_s11 = scalar_lea.vmem %s218_s7, 64 }
  0x51   : > { %p1344_p1 = scmp.ne.s32.totalorder %s218_s7, %s1343_s11  ;;  %p2199_p13 = pneg %p1818_p7 }
  0x52   : > { %s1684_s13 = smov [#allocation12]  }
  0x53   : > { %p1346_p5 = pnand %p1344_p1, %p2199_p13  ;;  %s1348_s19 = sshll.u32 %s1684_s13, 4  ;;  %s1349_s19 = int_to_ptr.vmem [resolvable:$false] %s1348_s19 }
  0x54   : > { %s1350_s10 = scalar_lea.vmem %s1349_s19, 128  ;;  %p1351_p9 = scmp.lt.s32.totalorder %s218_s7, %s1349_s19 }
  0x55   : > { %p1347_p2 = pneg %p1346_p5  ;;  %p1352_p3 = scmp.lt.s32.totalorder %s1350_s10, %s1343_s11 }
  0x56   : > { %1102 = dma.hbm_to_vmem [thread:$0]  (!%p1876_p6), %s2198_s2, 128, %s174_s17, [#allocation8]  }
  0x57   : > { %p1353_p8 = por %p1352_p3, %p1351_p9 }
  0x59   : > { %p1354_p10 = pnand %p1353_p8, %p1347_p2 }
  0x5b   : > { %1357 = shalt.err (!%p1354_p10)
}
  0x5c   : > { %1109 = dma.hbm_to_vmem [thread:$0]  (!%p1818_p7), %s1883_s29, 64, %s218_s7, %s1822_s9  }
  0x5d   : > { %p2200_p6 = scmp.ne.s32.totalorder %s2195_s20, 0 }
  0x5e   : > { %p2201_p13 = scmp.eq.s32.totalorder (!%p2200_p6), %s1833_s8, 0 }
  0x5f   : > { %226 = sbr.rel (%p2200_p6) target bundleno = 539 (0x21b), region = 32 }
  0x64   : > { %1607 = dma.done.wait (%p2201_p13), [#allocation8], 128   ;;  %p2202_p5 = pmov %p2201_p13 }
  0x65   : > { %s232_s17 = sand.u32 1, %s1833_s8   ;;  %s234_s12 = sand.u32 1, %s1652_s25  }
  0x66   : > { %1609 = vsyncadd (%p2202_p5), [#allocation8], 4294967168  ;;  %s1021_s15 = sshll.u32 %s234_s12, 8  ;;  %s233_s3 = scalar_lea.sflag [#allocation11], %s232_s17 }
  0x67   : > { %s1907_s6 = scalar_lea.vmem [#allocation10], %s1021_s15  ;;  %p2203_p1 = scmp.ne.s32.totalorder %s2190_s16, 0 }
  0x69   : > { %1611 = dma.done.wait (%p2203_p1), %s233_s3, 4160  }
  0x6a   : > { %1613 = vsyncadd (%p2203_p1), %s233_s3, 4294963136  ;;  %s1913_s29 = sshll.u32 %s234_s12, 2  ;;  %s2170_s9 = sand.u32 1, %s1640_s22  }
  0x6b   : > { %s1023_s7 = sshll.u32 %s2170_s9, 5  ;;  %p1024_p7 = scmp.ne.s32.totalorder %s1660_s0, 0 }
  0x6c   : > { %s1919_s8 = scalar_lea.vmem [#allocation13], %s1023_s7  ;;  %s1923_s18 = sshll.u32 (!%p1024_p7), %s1664_s27, 7 }
  0x6d   : > { %280 = sbr.rel (%p1024_p7) target bundleno = 294 (0x126), region = 48  ;;  %s289_s16 = sld [smem:[#allocation6 + %s1923_s18]] (!%p1024_p7) }
  0x6e   : > { %s1685_s11 = smov (!%p1024_p7), [#allocation2]   ;;  %s310_s19 = sadd.s32 (!%p1024_p7), 1, %s1923_s18 }
  0x6f   : > { %s299_s13 = sshll.u32 (!%p1024_p7), %s1685_s11, 4  ;;  %s1929_s10 = sld [smem:[#allocation6 + %s310_s19]] (!%p1024_p7)  ;;  %s1926_s13 = int_to_ptr.vmem [resolvable:$true] %s299_s13 }
  0x70   : > { %s1686_s17 = smov (!%p1024_p7), [#allocation2 + $0x1]   ;;  %s334_s15 = sadd.s32 (!%p1024_p7), 2, %s1923_s18 }
  0x71   : > { %s323_s12 = sshll.u32 (!%p1024_p7), %s1686_s17, 4  ;;  %s1934_s3 = sld [smem:[#allocation6 + %s334_s15]] (!%p1024_p7)  ;;  %s1932_s12 = int_to_ptr.vmem [resolvable:$true] %s323_s12 }
  0x72   : > { %s358_s7 = sadd.s32 3, %s1923_s18  ;;  %s1687_s20 = smov [#allocation2 + $0x2]  }
  0x73   : > { %s1026_s9 = sshll.u32 %s289_s16, 4  ;;  %s347_s2 = sshll.u32 %s1687_s20, 4  ;;  %s1940_s2 = int_to_ptr.vmem [resolvable:$true] %s347_s2 }
  0x74   : > { %s291_s11 = scalar_lea.hbm %s2157_s1, %s1026_s9  ;;  %s1945_s17 = scalar_lea.hbm %s2157_s1, 16384 }
  0x75   : > { %s1358_s26 = scalar_lea.hbm %s291_s11, 16  ;;  %p1361_p11 = scmp.lt.s32.totalorder %s291_s11, %s2157_s1 }
  0x76   : > { %p1359_p2 = scmp.ne.s32.totalorder %s291_s11, %s1358_s26  ;;  %p1362_p12 = scmp.lt.s32.totalorder %s1945_s17, %s1358_s26 }
  0x78   : > { %p1363_p0 = por %p1362_p12, %p1361_p11 }
  0x7a   : > { %p1364_p4 = pnand %p1363_p0, %p1359_p2 }
  0x7c   : > { %1367 = shalt.err (!%p1364_p4)  }
  0x7d   : > { %s1368_s4 = scalar_lea.vmem %s1926_s13, 16  ;;  %s1954_s28 = scalar_lea.vmem %s1926_s13, 128 }
  0x7e   : > { %p1369_p9 = scmp.ne.s32.totalorder %s1926_s13, %s1368_s4  ;;  %p1373_p3 = scmp.lt.s32.totalorder %s1926_s13, %s1926_s13 }
  0x7f   : > { %p1374_p8 = scmp.lt.s32.totalorder %s1954_s28, %s1368_s4 }
  0x81   : > { %p1375_p10 = por %p1374_p8, %p1373_p3 }
  0x83   : > { %p1376_p6 = pnand %p1375_p10, %p1369_p9 }
  0x85   : > { %1379 = shalt.err (!%p1376_p6)  }
  0x86   : > { %302 = dma.hbm_to_vmem [thread:$0]  %s291_s11, 16, %s1926_s13, [#allocation4] }
  0x87   : > { %s1028_s23 = sshll.u32 %s1929_s10, 4  ;;  %s1961_s25 = sld [smem:[#allocation6 + %s358_s7]] }
  0x88   : > { %s313_s20 = scalar_lea.hbm %s2157_s1, %s1028_s23  ;;  %s1030_s16 = sshll.u32 %s1934_s3, 4 }
  0x89   : > { %s1380_s19 = scalar_lea.hbm %s313_s20, 16  ;;  %p1383_p5 = scmp.lt.s32.totalorder %s313_s20, %s2157_s1 }
  0x8a   : > { %p1381_p13 = scmp.ne.s32.totalorder %s313_s20, %s1380_s19  ;;  %p1384_p1 = scmp.lt.s32.totalorder %s1945_s17, %s1380_s19 }
  0x8c   : > { %p1385_p7 = por %p1384_p1, %p1383_p5 }
  0x8e   : > { %p1386_p2 = pnand %p1385_p7, %p1381_p13 }
  0x90   : > { %1389 = shalt.err (!%p1386_p2)  }
  0x91   : > { %s1390_s10 = scalar_lea.vmem %s1932_s12, 16  ;;  %p1395_p12 = scmp.lt.s32.totalorder %s1932_s12, %s1926_s13 }
  0x92   : > { %p1391_p11 = scmp.ne.s32.totalorder %s1932_s12, %s1390_s10  ;;  %p1396_p0 = scmp.lt.s32.totalorder %s1954_s28, %s1390_s10 }
  0x94   : > { %p1397_p4 = por %p1396_p0, %p1395_p12 }
  0x96   : > { %p1398_p9 = pnand %p1397_p4, %p1391_p11 }
  0x98   : > { %1401 = shalt.err (!%p1398_p9)  }
  0x99   : > { %326 = dma.hbm_to_vmem [thread:$0]  %s313_s20, 16, %s1932_s12, [#allocation4 + $0x1] }
  0x9a   : > { %s337_s11 = scalar_lea.hbm %s2157_s1, %s1030_s16 }
  0x9b   : > { %s1402_s23 = scalar_lea.hbm %s337_s11, 16  ;;  %p1405_p8 = scmp.lt.s32.totalorder %s337_s11, %s2157_s1 }
  0x9c   : > { %p1403_p3 = scmp.ne.s32.totalorder %s337_s11, %s1402_s23  ;;  %p1406_p10 = scmp.lt.s32.totalorder %s1945_s17, %s1402_s23 }
  0x9e   : > { %p1407_p6 = por %p1406_p10, %p1405_p8 }
  0xa0   : > { %p1408_p13 = pnand %p1407_p6, %p1403_p3 }
  0xa2   : > { %1411 = shalt.err (!%p1408_p13)  }
  0xa3   : > { %s1412_s12 = scalar_lea.vmem %s1940_s2, 16  ;;  %p1417_p1 = scmp.lt.s32.totalorder %s1940_s2, %s1926_s13 }
  0xa4   : > { %p1413_p5 = scmp.ne.s32.totalorder %s1940_s2, %s1412_s12  ;;  %p1418_p7 = scmp.lt.s32.totalorder %s1954_s28, %s1412_s12 }
  0xa6   : > { %p1419_p2 = por %p1418_p7, %p1417_p1 }
  0xa8   : > { %p1420_p11 = pnand %p1419_p2, %p1413_p5 }
  0xaa   : > { %1423 = shalt.err (!%p1420_p11)  }
  0xab   : > { %350 = dma.hbm_to_vmem [thread:$0]  %s337_s11, 16, %s1940_s2, [#allocation4 + $0x2] }
  0xac   : > { %s1688_s20 = smov [#allocation2 + $0x3]   ;;  %s382_s19 = sadd.s32 4, %s1923_s18 }
  0xad   : > { %s371_s16 = sshll.u32 %s1688_s20, 4  ;;  %s1032_s15 = sshll.u32 %s1961_s25, 4  ;;  %s372_s16 = int_to_ptr.vmem [resolvable:$true] %s371_s16 }
  0xae   : > { %s361_s3 = scalar_lea.hbm %s2157_s1, %s1032_s15  ;;  %s383_s7 = sld [smem:[#allocation6 + %s382_s19]] }
  0xaf   : > { %s1424_s23 = scalar_lea.hbm %s361_s3, 16  ;;  %p1427_p0 = scmp.lt.s32.totalorder %s361_s3, %s2157_s1 }
  0xb0   : > { %p1425_p12 = scmp.ne.s32.totalorder %s361_s3, %s1424_s23  ;;  %p1428_p4 = scmp.lt.s32.totalorder %s1945_s17, %s1424_s23 }
  0xb2   : > { %p1429_p9 = por %p1428_p4, %p1427_p0 }
  0xb4   : > { %p1430_p3 = pnand %p1429_p9, %p1425_p12 }
  0xb6   : > { %1433 = shalt.err (!%p1430_p3)  }
  0xb7   : > { %s1434_s2 = scalar_lea.vmem %s372_s16, 16  ;;  %p1439_p10 = scmp.lt.s32.totalorder %s372_s16, %s1926_s13 }
  0xb8   : > { %p1435_p8 = scmp.ne.s32.totalorder %s372_s16, %s1434_s2  ;;  %p1440_p6 = scmp.lt.s32.totalorder %s1954_s28, %s1434_s2 }
  0xba   : > { %p1441_p13 = por %p1440_p6, %p1439_p10 }
  0xbc   : > { %p1442_p5 = pnand %p1441_p13, %p1435_p8 }
  0xbe   : > { %1445 = shalt.err (!%p1442_p5)  }
  0xbf   : > { %374 = dma.hbm_to_vmem [thread:$0]  %s361_s3, 16, %s372_s16, [#allocation4 + $0x3] }
  0xc0   : > { %s406_s25 = sadd.s32 5, %s1923_s18  ;;  %s1689_s11 = smov [#allocation2 + $0x4]  }
  0xc1   : > { %s395_s12 = sshll.u32 %s1689_s11, 4  ;;  %s407_s20 = sld [smem:[#allocation6 + %s406_s25]]  ;;  %s396_s12 = int_to_ptr.vmem [resolvable:$true] %s395_s12 }
  0xc2   : > { %s1690_s19 = smov [#allocation2 + $0x5]   ;;  %s430_s4 = sadd.s32 6, %s1923_s18 }
  0xc3   : > { %s419_s15 = sshll.u32 %s1690_s19, 4  ;;  %s1034_s10 = sshll.u32 %s383_s7, 4  ;;  %s2003_s15 = int_to_ptr.vmem [resolvable:$true] %s419_s15 }
  0xc4   : > { %s385_s9 = scalar_lea.hbm %s2157_s1, %s1034_s10  ;;  %s2008_s2 = sld [smem:[#allocation6 + %s430_s4]] }
  0xc5   : > { %s1446_s16 = scalar_lea.hbm %s385_s9, 16  ;;  %p1449_p7 = scmp.lt.s32.totalorder %s385_s9, %s2157_s1 }
  0xc6   : > { %p1447_p1 = scmp.ne.s32.totalorder %s385_s9, %s1446_s16  ;;  %p1450_p2 = scmp.lt.s32.totalorder %s1945_s17, %s1446_s16 }
  0xc8   : > { %p1451_p11 = por %p1450_p2, %p1449_p7 }
  0xca   : > { %p1452_p12 = pnand %p1451_p11, %p1447_p1 }
  0xcc   : > { %1455 = shalt.err (!%p1452_p12)  }
  0xcd   : > { %s1456_s25 = scalar_lea.vmem %s396_s12, 16  ;;  %p1461_p4 = scmp.lt.s32.totalorder %s396_s12, %s1926_s13 }
  0xce   : > { %p1457_p0 = scmp.ne.s32.totalorder %s396_s12, %s1456_s25  ;;  %p1462_p9 = scmp.lt.s32.totalorder %s1954_s28, %s1456_s25 }
  0xd0   : > { %p1463_p3 = por %p1462_p9, %p1461_p4 }
  0xd2   : > { %p1464_p8 = pnand %p1463_p3, %p1457_p0 }
  0xd4   : > { %1467 = shalt.err (!%p1464_p8)  }
  0xd5   : > { %398 = dma.hbm_to_vmem [thread:$0]  %s385_s9, 16, %s396_s12, [#allocation4 + $0x4] }
  0xd6   : > { %s1036_s7 = sshll.u32 %s407_s20, 4  ;;  %s1691_s4 = smov [#allocation2 + $0x6]  }
  0xd7   : > { %s409_s14 = scalar_lea.hbm %s2157_s1, %s1036_s7  ;;  %s443_s10 = sshll.u32 %s1691_s4, 4  ;;  %s444_s10 = int_to_ptr.vmem [resolvable:$true] %s443_s10 }
  0xd8   : > { %s1468_s23 = scalar_lea.hbm %s409_s14, 16  ;;  %p1471_p6 = scmp.lt.s32.totalorder %s409_s14, %s2157_s1 }
  0xd9   : > { %p1469_p10 = scmp.ne.s32.totalorder %s409_s14, %s1468_s23  ;;  %p1472_p13 = scmp.lt.s32.totalorder %s1945_s17, %s1468_s23 }
  0xdb   : > { %p1473_p5 = por %p1472_p13, %p1471_p6 }
  0xdd   : > { %p1474_p1 = pnand %p1473_p5, %p1469_p10 }
  0xdf   : > { %1477 = shalt.err (!%p1474_p1)  }
  0xe0   : > { %s1478_s12 = scalar_lea.vmem %s2003_s15, 16  ;;  %p1483_p2 = scmp.lt.s32.totalorder %s2003_s15, %s1926_s13 }
  0xe1   : > { %p1479_p7 = scmp.ne.s32.totalorder %s2003_s15, %s1478_s12  ;;  %p1484_p11 = scmp.lt.s32.totalorder %s1954_s28, %s1478_s12 }
  0xe3   : > { %p1485_p12 = por %p1484_p11, %p1483_p2 }
  0xe5   : > { %p1486_p0 = pnand %p1485_p12, %p1479_p7 }
  0xe7   : > { %1489 = shalt.err (!%p1486_p0)  }
  0xe8   : > { %422 = dma.hbm_to_vmem [thread:$0]  %s409_s14, 16, %s2003_s15, [#allocation4 + $0x5] }
  0xe9   : > { %s454_s20 = sadd.s32 7, %s1923_s18  ;;  %s1038_s9 = sshll.u32 %s2008_s2, 4 }
  0xea   : > { %s455_s3 = sld [smem:[#allocation6 + %s454_s20]]  ;;  %s433_s11 = scalar_lea.hbm %s2157_s1, %s1038_s9 }
  0xeb   : > { %s1490_s19 = scalar_lea.hbm %s433_s11, 16  ;;  %p1493_p9 = scmp.lt.s32.totalorder %s433_s11, %s2157_s1 }
  0xec   : > { %p1491_p4 = scmp.ne.s32.totalorder %s433_s11, %s1490_s19  ;;  %p1494_p3 = scmp.lt.s32.totalorder %s1945_s17, %s1490_s19 }
  0xee   : > { %p1495_p8 = por %p1494_p3, %p1493_p9 }
  0xf0   : > { %p1496_p10 = pnand %p1495_p8, %p1491_p4 }
  0xf2   : > { %1499 = shalt.err (!%p1496_p10)  }
  0xf3   : > { %s1500_s26 = scalar_lea.vmem %s444_s10, 16  ;;  %p1505_p13 = scmp.lt.s32.totalorder %s444_s10, %s1926_s13 }
  0xf4   : > { %p1501_p6 = scmp.ne.s32.totalorder %s444_s10, %s1500_s26  ;;  %p1506_p5 = scmp.lt.s32.totalorder %s1954_s28, %s1500_s26 }
  0xf6   : > { %p1507_p1 = por %p1506_p5, %p1505_p13 }
  0xf8   : > { %p1508_p7 = pnand %p1507_p1, %p1501_p6 }
  0xfa   : > { %1511 = shalt.err (!%p1508_p7)  }
  0xfb   : > { %446 = dma.hbm_to_vmem [thread:$0]  %s433_s11, 16, %s444_s10, [#allocation4 + $0x6] }
  0xfc   : > { %s1692_s18 = smov [#allocation2 + $0x7]   ;;  %s1040_s2 = sshll.u32 %s455_s3, 4 }
  0xfd   : > { %s467_s15 = sshll.u32 %s1692_s18, 4  ;;  %s457_s12 = scalar_lea.hbm %s2157_s1, %s1040_s2  ;;  %s468_s15 = int_to_ptr.vmem [resolvable:$true] %s467_s15 }
  0xfe   : > { %s1512_s20 = scalar_lea.hbm %s457_s12, 16  ;;  %p1515_p11 = scmp.lt.s32.totalorder %s457_s12, %s2157_s1 }
  0xff   : > { %p1513_p2 = scmp.ne.s32.totalorder %s457_s12, %s1512_s20  ;;  %p1516_p12 = scmp.lt.s32.totalorder %s1945_s17, %s1512_s20 }
 0x101   : > { %p1517_p0 = por %p1516_p12, %p1515_p11 }
 0x103   : > { %p1518_p4 = pnand %p1517_p0, %p1513_p2 }
 0x105   : > { %1521 = shalt.err (!%p1518_p4)  }
 0x106   : > { %s1522_s10 = scalar_lea.vmem %s468_s15, 16  ;;  %p1527_p3 = scmp.lt.s32.totalorder %s468_s15, %s1926_s13 }
 0x107   : > { %p1523_p9 = scmp.ne.s32.totalorder %s468_s15, %s1522_s10  ;;  %p1528_p8 = scmp.lt.s32.totalorder %s1954_s28, %s1522_s10 }
 0x109   : > { %p1529_p10 = por %p1528_p8, %p1527_p3 }
 0x10b   : > { %p1530_p6 = pnand %p1529_p10, %p1523_p9 }
 0x10d   : > { %1533 = shalt.err (!%p1530_p6)  }
 0x10e   : > { %470 = dma.hbm_to_vmem [thread:$0]  %s457_s12, 16, %s468_s15, [#allocation4 + $0x7] }
 0x10f   : > { %1614 = dma.done.wait [#allocation4], 16 }
 0x110   : > { %1615 = vsyncadd [#allocation4], 4294967280 }
 0x111   : > { %1616 = dma.done.wait [#allocation4 + $0x1], 16 }
 0x112   : > { %1617 = vsyncadd [#allocation4 + $0x1], 4294967280 }
 0x113   : > { %1618 = dma.done.wait [#allocation4 + $0x2], 16 }
 0x114   : > { %1619 = vsyncadd [#allocation4 + $0x2], 4294967280 }
 0x115   : > { %1620 = dma.done.wait [#allocation4 + $0x3], 16 }
 0x116   : > { %1621 = vsyncadd [#allocation4 + $0x3], 4294967280 }
 0x117   : > { %1622 = dma.done.wait [#allocation4 + $0x4], 16 }
 0x118   : > { %1623 = vsyncadd [#allocation4 + $0x4], 4294967280 }
 0x119   : > { %1624 = dma.done.wait [#allocation4 + $0x5], 16 }
 0x11a   : > { %1625 = vsyncadd [#allocation4 + $0x5], 4294967280 }
 0x11b   : > { %1626 = dma.done.wait [#allocation4 + $0x6], 16 }
 0x11c   : > { %1627 = vsyncadd [#allocation4 + $0x6], 4294967280 }
 0x11d   : > { %1628 = dma.done.wait [#allocation4 + $0x7], 16 }
 0x11e   : > { %1629 = vsyncadd [#allocation4 + $0x7], 4294967280  ;;  %v488_v0 = vld [vmem:[#allocation2] sm:$0xff]  ;;  %v490_v1 = vld [vmem:[#allocation7] sm:$0xff] }
 0x11f   : > { %v489_v2 = vmul.f32 11.313708, %v488_v0 }
 0x121   : > { %v491_v3 = vadd.f32 %v490_v1, %v489_v2 }
 0x123   : > { %v492_v4 = vpack.c.bf16 %v491_v3, %v491_v3 }
 0x125   : > { %493 = vst [vmem:[#allocation3] sm:$0xf] %v492_v4 }
 0x126 PF: > { %v1220_v5 = vld [vmem:[%s1907_s6 + $0xe4] ss:$16 sps:$4 sm:$0xff]   ;;  %v1222_v6 = vld [vmem:[%s1907_s6 + $0xec] ss:$16 sps:$4 sm:$0xff]   ;;  %v1693_v7 = vmov 0   ;;  %v529_v39 = vlaneseq  ;;  %s2204_s13 = scalar_lea.vmem [#allocation12], %s1913_s29 }
 0x127   : > { %741 = vmatprep.mubr.bf16.mxu0 %v1693_v7  ;;  %782 = vmatprep.mubr.bf16.mxu1 %v1693_v7  ;;  %v1224_v8 = vld [vmem:[%s1907_s6 + $0xe0] ss:$16 sps:$4 sm:$0xff]   ;;  %v1225_v9 = vld [vmem:[%s1907_s6 + $0xe8] ss:$16 sps:$4 sm:$0xff]   ;;  %v1226_v10 = vld [vmem:[%s1907_s6 + $0xc4] ss:$16 sps:$4 sm:$0xff]  }
 0x128   : > { %709 = vmatprep.subr.bf16.mxu0 %v1220_v5  ;;  %750 = vmatprep.subr.bf16.mxu1 %v1222_v6  ;;  %v1228_v11 = vld [vmem:[%s1907_s6 + $0xcc] ss:$16 sps:$4 sm:$0xff]   ;;  %v1230_v12 = vld [vmem:[%s1907_s6 + $0xc0] ss:$16 sps:$4 sm:$0xff]   ;;  %v1231_v13 = vld [vmem:[%s1907_s6 + $0xc8] ss:$16 sps:$4 sm:$0xff]  }
 0x129   : > { %710 = vmatpush1.bf16.msra.mxu0 %v1224_v8  ;;  %751 = vmatpush1.bf16.msra.mxu1 %v1225_v9  ;;  %v1232_v14 = vld [vmem:[%s1907_s6 + $0xa4] ss:$16 sps:$4 sm:$0xff]   ;;  %v1234_v15 = vld [vmem:[%s1907_s6 + $0xac] ss:$16 sps:$4 sm:$0xff]   ;;  %v1236_v16 = vld [vmem:[%s1907_s6 + $0xa0] ss:$16 sps:$4 sm:$0xff]  }
 0x12a   : > { %711 = vmatprep.subr.bf16.mxu0 %v1226_v10  ;;  %752 = vmatprep.subr.bf16.mxu1 %v1228_v11  ;;  %v1237_v17 = vld [vmem:[%s1907_s6 + $0xa8] ss:$16 sps:$4 sm:$0xff]   ;;  %v1238_v18 = vld [vmem:[%s1907_s6 + $0x84] ss:$16 sps:$4 sm:$0xff]   ;;  %v1240_v19 = vld [vmem:[%s1907_s6 + $0x8c] ss:$16 sps:$4 sm:$0xff]  }
 0x12b   : > { %v1242_v20 = vld [vmem:[%s1907_s6 + $0x80] ss:$16 sps:$4 sm:$0xff]   ;;  %v1243_v21 = vld [vmem:[%s1907_s6 + $0x88] ss:$16 sps:$4 sm:$0xff]   ;;  %v1244_v22 = vld [vmem:[%s1907_s6 + $0x64] ss:$16 sps:$4 sm:$0xff]  }
 0x12c   : > { %v1246_v23 = vld [vmem:[%s1907_s6 + $0x6c] ss:$16 sps:$4 sm:$0xff]   ;;  %v1248_v24 = vld [vmem:[%s1907_s6 + $0x60] ss:$16 sps:$4 sm:$0xff]   ;;  %v1249_v25 = vld [vmem:[%s1907_s6 + $0x68] ss:$16 sps:$4 sm:$0xff]  }
 0x12d   : > { %712 = vmatpush1.bf16.msra.mxu0 %v1230_v12  ;;  %753 = vmatpush1.bf16.msra.mxu1 %v1231_v13  ;;  %v1250_v26 = vld [vmem:[%s1907_s6 + $0x44] ss:$16 sps:$4 sm:$0xff]   ;;  %v1252_v27 = vld [vmem:[%s1907_s6 + $0x4c] ss:$16 sps:$4 sm:$0xff]   ;;  %v1254_v28 = vld [vmem:[%s1907_s6 + $0x40] ss:$16 sps:$4 sm:$0xff]  }
 0x12e   : > { %713 = vmatprep.subr.bf16.mxu0 %v1232_v14  ;;  %754 = vmatprep.subr.bf16.mxu1 %v1234_v15  ;;  %v1255_v29 = vld [vmem:[%s1907_s6 + $0x48] ss:$16 sps:$4 sm:$0xff]   ;;  %v1256_v30 = vld [vmem:[%s1907_s6 + $0x24] ss:$16 sps:$4 sm:$0xff]   ;;  %v1258_v31 = vld [vmem:[%s1907_s6 + $0x2c] ss:$16 sps:$4 sm:$0xff]  }
 0x12f   : > { %v1260_v32 = vld [vmem:[%s1907_s6 + $0x20] ss:$16 sps:$4 sm:$0xff]   ;;  %v1261_v33 = vld [vmem:[%s1907_s6 + $0x28] ss:$16 sps:$4 sm:$0xff]   ;;  %v1262_v34 = vld [vmem:[%s1907_s6 + $0x4] ss:$16 sps:$4 sm:$0xff]  }
 0x130   : > { %v1264_v35 = vld [vmem:[%s1907_s6 + $0xc] ss:$16 sps:$4 sm:$0xff]   ;;  %v1266_v36 = vld [vmem:[%s1907_s6] ss:$16 sps:$4 sm:$0xff]   ;;  %v1267_v37 = vld [vmem:[%s1907_s6 + $0x8] ss:$16 sps:$4 sm:$0xff]  }
 0x131   : > { %714 = vmatpush1.bf16.msra.mxu0 %v1236_v16  ;;  %755 = vmatpush1.bf16.msra.mxu1 %v1237_v17  ;;  %v494_v38 = vld [vmem:[#allocation3] sm:$0xf]  ;;  %v530_v40 = vshrl.u32 %v529_v39, 7  ;;  %v527_v43 = vld [vmem:[%s2204_s13] sm:$0xf]  ;;  %s1074_s17 = sshll.u32 %s1660_s0, 2 }
 0x132   : > { %715 = vmatprep.subr.bf16.mxu0 %v1238_v18  ;;  %756 = vmatprep.subr.bf16.mxu1 %v1240_v19  ;;  %s1075_s28 = sshll.u32 %s1664_s27, 3  ;;  %s814_s7 = sshll.u32 %s1919_s8, 4  ;;  %s2093_s7 = int_to_ptr.vmem [resolvable:$true] %s814_s7 }
 0x133   : > { %v531_v41 = vsub.s32 0, %v530_v40  ;;  %v539_v42 = vsub.s32 2, %v530_v40  ;;  %v535_v44 = vsub.s32 1, %v530_v40  ;;  %v543_v45 = vsub.s32 3, %v530_v40  ;;  %s810_s6 = sadd.s32 %s1075_s28, %s1074_s17  ;;  %s2205_s11 = sand.u32 1, %s1640_s22  }
 0x134   : > { %s1076_s3 = sshll.u32 %s810_s6, 7  ;;  %s796_s19 = scalar_lea.sflag [#allocation9], %s2205_s11 }
 0x135   : > { %716 = vmatpush1.bf16.msra.mxu0 %v1242_v20  ;;  %757 = vmatpush1.bf16.msra.mxu1 %v1243_v21  ;;  %v532_v46 = vrot.slane %v527_v43, %v531_v41  ;;  %v540_v47 = vrot.slane %v527_v43, %v539_v42  ;;  %v536_v48 = vrot.slane %v527_v43, %v535_v44  ;;  %s2091_s29 = scalar_lea.hbm %s2161_s5, %s1076_s3  ;;  %s1534_s4 = scalar_lea.vmem %s2093_s7, 512 }
 0x136   : > { %717 = vmatprep.subr.bf16.mxu0 %v1244_v22  ;;  %758 = vmatprep.subr.bf16.mxu1 %v1246_v23  ;;  %v544_v49 = vrot.slane %v527_v43, %v543_v45  ;;  %p1535_p13 = scmp.ne.s32.totalorder %s2093_s7, %s1534_s4  ;;  %p2206_p5 = scmp.ne.s32.totalorder %s2192_s24, 0 }
 0x137   : > { %s1694_s23 = smov [#allocation13]  }
 0x138   : > { %p1536_p1 = pnand %p1535_p13, %p2206_p5  ;;  %s1538_s26 = sshll.u32 %s1694_s23, 4  ;;  %s1539_s26 = int_to_ptr.vmem [resolvable:$false] %s1538_s26 }
 0x139   : > { %718 = vmatpush1.bf16.msra.mxu0 %v1248_v24  ;;  %759 = vmatpush1.bf16.msra.mxu1 %v1249_v25  ;;  %s1540_s18 = scalar_lea.vmem %s1539_s26, 1024  ;;  %p1541_p2 = scmp.lt.s32.totalorder %s2093_s7, %s1539_s26 }
 0x13a   : > { %719 = vmatprep.subr.bf16.mxu0 %v1250_v26  ;;  %760 = vmatprep.subr.bf16.mxu1 %v1252_v27  ;;  %p1537_p7 = pneg %p1536_p1  ;;  %p1542_p11 = scmp.lt.s32.totalorder %s1540_s18, %s1534_s4 }
 0x13c   : > { %p1543_p12 = por %p1542_p11, %p1541_p2 }
 0x13d   : > { %720 = vmatpush1.bf16.msra.mxu0 %v1254_v28  ;;  %761 = vmatpush1.bf16.msra.mxu1 %v1255_v29 }
 0x13e   : > { %721 = vmatprep.subr.bf16.mxu0 %v1256_v30  ;;  %762 = vmatprep.subr.bf16.mxu1 %v1258_v31  ;;  %p1544_p0 = pnand %p1543_p12, %p1537_p7 }
 0x141   : > { %722 = vmatpush1.bf16.msra.mxu0 %v1260_v32  ;;  %763 = vmatpush1.bf16.msra.mxu1 %v1261_v33 }
 0x142   : > { %723 = vmatprep.subr.bf16.mxu0 %v1262_v34  ;;  %764 = vmatprep.subr.bf16.mxu1 %v1264_v35 }
 0x145   : > { %724 = vmatpush1.bf16.msra.mxu0 %v1266_v36  ;;  %765 = vmatpush1.bf16.msra.mxu1 %v1267_v37 }
 0x148   : > { %742 = vmatmul.mubr.bf16.vlgmr.msra.gmra.mxu0 %v494_v38  ;;  %783 = vmatmul.mubr.bf16.vlgmr.msra.gmra.mxu1 %v494_v38 }
 0x208   : > { %v743_v50 = vpop.f32.mrf.mxu0  ;;  %v784_v51 = vpop.f32.mrf.mxu1 }
 0x209   : > { %v744_v52 = vadd.f32 %v743_v50, %v532_v46  ;;  %v785_v53 = vadd.f32 %v784_v51, %v540_v47 }
 0x20a   : > { %v745_v54 = vpop.f32.mrf.mxu0  ;;  %v786_v55 = vpop.f32.mrf.mxu1 }
 0x20b   : > { %791 = vst [vmem:[%s1919_s8] sm:$0xff] %v744_v52  ;;  %793 = vst [vmem:[%s1919_s8 + $0x10] sm:$0xff] %v785_v53  ;;  %v746_v56 = vadd.f32 %v745_v54, %v536_v48  ;;  %v787_v57 = vadd.f32 %v786_v55, %v544_v49 }
 0x20c   : > { %v747_v58 = vpop.f32.mrf.mxu0  ;;  %v788_v59 = vpop.f32.mrf.mxu1 }
 0x20d   : > { %792 = vst [vmem:[%s1919_s8 + $0x8] sm:$0xff] %v746_v56  ;;  %794 = vst [vmem:[%s1919_s8 + $0x18] sm:$0xff] %v787_v57 }
 0x20e   : > { %v748_v60 = vpop.f32.mrf.mxu0  ;;  %v789_v61 = vpop.f32.mrf.mxu1 }
 0x20f   : > { %1547 = shalt.err (!%p1544_p0)
}
 0x210   : > { %s1548_s8 = scalar_lea.hbm %s2091_s29, 512  ;;  %s1552_s14 = scalar_lea.hbm %s2161_s5, 2048 }
 0x211   : > { %p1549_p4 = scmp.ne.s32.totalorder %s2091_s29, %s1548_s8  ;;  %p1553_p8 = scmp.lt.s32.totalorder %s2091_s29, %s2161_s5 }
 0x212   : > { %p1554_p10 = scmp.lt.s32.totalorder %s1552_s14, %s1548_s8 }
 0x213   : > { %p1550_p9 = pnand %p1549_p4, %p2206_p5 }
 0x214   : > { %p1555_p6 = por %p1554_p10, %p1553_p8 }
 0x215   : > { %p1551_p3 = pneg %p1550_p9 }
 0x217   : > { %p1556_p13 = pnand %p1555_p6, %p1551_p3 }
 0x219   : > { %1559 = shalt.err (!%p1556_p13)
}
 0x21a   : > { %1097 = dma.vmem_to_hbm [thread:$0]  (%p2206_p5), %s2093_s7, 512, %s2091_s29, %s796_s19  }
 0x21b PF: > { %s2207_s20 = sld [smem:[#allocation53_spill]]  ;;  %p1117_p1 = scmp.ge.s32.totalorder %s1676_s30, 2 }
 0x21c   : > { %s826_s9 = sand.u32 1, %s1636_s21  }
 0x21d   : > { %s827_s25 = scalar_lea.sflag [#allocation9], %s826_s9 }
 0x221   : > { %p2208_p7 = scmp.ne.s32.totalorder %s2207_s20, 0 }
 0x223   : > { %p1111_p2 = pnand %p1117_p1, %p2208_p7 }
 0x225   : > { %p1112_p11 = pneg %p1111_p2 }
 0x227   : > { %1631 = dma.done.wait (%p1112_p11), %s827_s25, 512  }
 0x228   : > { %1633 = vsyncadd (%p1112_p11), %s827_s25, 4294966784  ;;  %s26_s30 = sadd.s32 1, %s1676_s30   ;;  %s2209_s24 = sld [smem:[#allocation44_spill]] }
 0x229   : > { %p23_p12 = scmp.ge.s32.totalorder %s26_s30, 6   ;;  %s2210_s23 = sld [smem:[#allocation52_spill]] }
 0x22a   : > { %s2211_s10 = sld [smem:[#allocation45_spill]]  ;;  %s2218_s21 = smov %s1640_s22 }
 0x22b   : > { %s2212_s25 = sld [smem:[#allocation46_spill]] }
 0x22c   : > { %s2213_s26 = sld [smem:[#allocation51_spill]]  ;;  %25 = sbr.rel (!%p23_p12) target bundleno = 18 (0x12), region = 159 }
 0x22d   : > { %s2214_s0 = sld [smem:[#allocation47_spill]] }
 0x22e   : > { %s2215_s27 = sld [smem:[#allocation48_spill]]  ;;  %s2219_s22 = smov %s2209_s24 }
 0x22f   : > { %s2216_s28 = sld [smem:[#allocation49_spill]] }
 0x230   : > { %s2217_s29 = sld [smem:[#allocation50_spill]]  ;;  %s2220_s24 = smov %s2211_s10 }
 0x231   :  { %832 = vsyncpa [#allocation8], 1 }
 0x232   :  { %834 = vsyncpa [#allocation8 + $0x1], 1 }
 0x233   :  { %835 = vsyncpa [#allocation11], 1 }
 0x234   :  { %837 = vsyncpa [#allocation11 + $0x1], 1 }
 0x235   :  { %838 = vsyncpa [#allocation9], 1 }
 0x236   :  { %840 = vsyncpa [#allocation9 + $0x1], 1 }
 0x237   :  { %841 = vsyncmov [#allocation4] }
 0x23a   :  { %s842_s13 = vpop.sfrf %841 }
 0x23b   :  { %p1079_p5 = scmp.ne.s32.totalorder %s842_s13, 0 }
 0x23d   :  { %846 = shalt.err (%p1079_p5)  }
 0x23e   :  { %848 = vsyncmov [#allocation4 + $0x1] }
 0x241   :  { %s849_s17 = vpop.sfrf %848 }
 0x242   :  { %p1080_p0 = scmp.ne.s32.totalorder %s849_s17, 0 }
 0x244   :  { %853 = shalt.err (%p1080_p0)  }
 0x245   :  { %855 = vsyncmov [#allocation4 + $0x2] }
 0x248   :  { %s856_s6 = vpop.sfrf %855 }
 0x249   :  { %p1081_p4 = scmp.ne.s32.totalorder %s856_s6, 0 }
 0x24b   :  { %860 = shalt.err (%p1081_p4)  }
 0x24c   :  { %862 = vsyncmov [#allocation4 + $0x3] }
 0x24f   :  { %s863_s30 = vpop.sfrf %862 }
 0x250   :  { %p1082_p9 = scmp.ne.s32.totalorder %s863_s30, 0 }
 0x252   :  { %867 = shalt.err (%p1082_p9)  }
 0x253   :  { %869 = vsyncmov [#allocation4 + $0x4] }
 0x256   :  { %s870_s1 = vpop.sfrf %869 }
 0x257   :  { %p1083_p3 = scmp.ne.s32.totalorder %s870_s1, 0 }
 0x259   :  { %874 = shalt.err (%p1083_p3)  }
 0x25a   :  { %876 = vsyncmov [#allocation4 + $0x5] }
 0x25d   :  { %s877_s5 = vpop.sfrf %876 }
 0x25e   :  { %p1084_p8 = scmp.ne.s32.totalorder %s877_s5, 0 }
 0x260   :  { %881 = shalt.err (%p1084_p8)  }
 0x261   :  { %883 = vsyncmov [#allocation4 + $0x6] }
 0x264   :  { %s884_s21 = vpop.sfrf %883 }
 0x265   :  { %p1085_p10 = scmp.ne.s32.totalorder %s884_s21, 0 }
 0x267   :  { %888 = shalt.err (%p1085_p10)  }
 0x268   :  { %890 = vsyncmov [#allocation4 + $0x7] }
 0x26b   :  { %s891_s22 = vpop.sfrf %890 }
 0x26c   :  { %p1086_p6 = scmp.ne.s32.totalorder %s891_s22, 0 }
 0x26e   :  { %895 = shalt.err (%p1086_p6)  }

</bundles_post_ra>
